<compile_context>
chip_gen: v6e
topology: v6e:2x2x1
jax: 0.10.0
libtpu: 0.0.40
codegen_flags: <defaults>
</compile_context>

<pallas_src>
import numpy as np
import jax
import jax.numpy as jnp
from jax.experimental import pallas as pl
from jax.experimental.pallas import tpu as pltpu

EPS = 0.0061
# The max/max/clamp epilogue chain reduces to where(v1 < EPS, 1.0, v1) only
# because a bool promoted to float is 0/1 and EPS < 1.0.
assert 0.0 < EPS < 1.0


def _round_up(x, m):
    return ((x + m - 1) // m) * m


def _cdiv(a, b):
    return -(-a // b)


def _out_len(lin, k, s, p, d):
    return (lin - 1) * s - 2 * p + d * (k - 1) + 1


def _gather_idx(lin, k, s, p, d):
    """Transposed-conv gather indices. Invalid (tap, output-pos) pairs point at
    index `lin`, i.e. the zero plane appended to the padded input, so no
    separate validity-mask multiply is needed."""
    lout = _out_len(lin, k, s, p, d)
    kk = np.arange(k)[:, None]
    oo = np.arange(lout)[None, :]
    t = oo + p - kk * d
    valid = (t >= 0) & (t % s == 0) & (t // s < lin)
    idx = np.where(valid, np.clip(t // s, 0, lin - 1), lin).astype(np.int32)
    return idx, lout


def _convt_epilogue_kernel(w_ref, b_ref, g_ref, o_ref):
    # w_ref: (Rows_pad, GBM_pad) bf16 block-diagonal packed grouped weights
    # b_ref: (Rows_pad, 1) f32     g_ref: (GBM_pad, TILE_S) bf16
    # o_ref: (Rows_pad, TILE_S) f32
    v1 = jnp.dot(w_ref[...], g_ref[...], preferred_element_type=jnp.float32)
    v1 = v1 + b_ref[...]                              # conv-transpose bias
    # Epilogue of the original forward reduces to where(v1 < eps, 1.0, v1).
    o_ref[...] = jnp.where(v1 < EPS, jnp.float32(1.0), v1)


def _vmem_capacity_bytes():
    try:
        return int(pltpu.get_tpu_info().vmem_capacity_bytes)
    except Exception:
        return 64 * 1024 * 1024   # conservative fallback (v7x per-core VMEM)


def model_forward(x, weight, bias, *, stride, padding, dilation, groups,
                  max_tile_s=8192):
    """x: (N,Cin,D,H,W) f32; weight: (Cin, Cout//groups, kD,kH,kW); bias: (Cout,)."""
    N, Cin, Din, Hin, Win = x.shape
    Cout_g, kD, kH, kW = weight.shape[1], weight.shape[2], weight.shape[3], weight.shape[4]
    Cin_g = Cin // groups
    Cout = Cout_g * groups
    K = kD * kH * kW
    M = Cin_g * K

    idx_d, Dout = _gather_idx(Din, kD, stride, padding, dilation)
    idx_h, Hout = _gather_idx(Hin, kH, stride, padding, dilation)
    idx_w, Wout = _gather_idx(Win, kW, stride, padding, dilation)
    S = Dout * Hout * Wout
    NS = N * S

    # --- group packing: GB groups per block-diagonal MXU pass ----------------
    # Keep GB*M <= 256 so the packed weights still fit a single MXU weight tile
    # (v6e/v7x); prefer a divisor of `groups` to avoid padded (dead) groups.
    cap = max(1, min(groups, 256 // max(M, 1)))
    GB = 1
    for dvs in range(1, cap + 1):
        if groups % dvs == 0:
            GB = dvs
    if GB < max(1, cap // 2):
        GB = cap                          # accept a little group padding instead
    n_gb = _cdiv(groups, GB)
    G_tot = n_gb * GB

    Rows = GB * Cout_g
    Rows_pad = _round_up(Rows, 8)         # f32 output sublane alignment
    GBM = GB * M
    GBM_pad = _round_up(GBM, 16)          # bf16 sublane alignment

    # --- lane tiling: big 128-aligned tiles, only the last tile is padded ----
    vcap = _vmem_capacity_bytes()
    usable = max(16 * 1024 * 1024, (vcap * 3) // 4)   # leave Mosaic headroom

    def _vmem_need(tile_s):
        return 2 * (Rows_pad * GBM_pad * 2     # W (bf16), double-buffer reservation
                    + Rows_pad * 4             # bias (f32)
                    + GBM_pad * tile_s * 2     # G tile (bf16)
                    + Rows_pad * tile_s * 4)   # out tile (f32)

    TILE_S = min(_round_up(max_tile_s, 128), _round_up(max(NS, 1), 128))
    while _vmem_need(TILE_S) > usable and TILE_S > 256:
        TILE_S = max(256, _round_up(TILE_S // 2, 128))
    n_s_tiles = _cdiv(NS, TILE_S)
    NS_pad = n_s_tiles * TILE_S

    # --- im2col for the transposed conv (bf16 glue, mask folded into gather) -
    xb = jnp.pad(x.astype(jnp.bfloat16),
                 ((0, 0), (0, 0), (0, 1), (0, 1), (0, 1)))   # zero planes
    xg = xb[:, :, idx_d, :, :]                 # (N,Cin,kD,Dout,Hin+1,Win+1)
    xg = xg[:, :, :, :, idx_h, :]              # (N,Cin,kD,Dout,kH,Hout,Win+1)
    xg = xg[..., idx_w]                        # (N,Cin,kD,Dout,kH,Hout,kW,Wout)
    xg = jnp.transpose(xg, (1, 2, 4, 6, 0, 3, 5, 7))  # (Cin,kD,kH,kW,N,Do,Ho,Wo)
    G = xg.reshape(groups, M, NS)
    if G_tot > groups:
        G = jnp.pad(G, ((0, G_tot - groups), (0, 0), (0, 0)))
    Gp = G.reshape(n_gb, GBM, NS)
    Gp = jnp.pad(Gp, ((0, 0), (0, GBM_pad - GBM), (0, NS_pad - NS)))

    # --- block-diagonal packed weights: (n_gb, Rows_pad, GBM_pad) bf16 -------
    Wm = weight.reshape(groups, Cin_g, Cout_g, K)
    Wm = jnp.transpose(Wm, (0, 2, 1, 3)).reshape(groups, Cout_g, M)
    if G_tot > groups:
        Wm = jnp.pad(Wm, ((0, G_tot - groups), (0, 0), (0, 0)))
    Wg = Wm.reshape(n_gb, GB, Cout_g, M)
    eye = jnp.eye(GB, dtype=Wg.dtype)
    Wbd = jnp.einsum('nbcm,bk->nbckm', Wg, eye).reshape(n_gb, Rows, GBM)
    Wbd = jnp.pad(Wbd, ((0, 0), (0, Rows_pad - Rows), (0, GBM_pad - GBM)))
    Wbd = Wbd.astype(jnp.bfloat16)

    # --- bias as its own tiny f32 input (added inside the kernel) ------------
    Bm = bias.astype(jnp.float32).reshape(groups, Cout_g)
    if G_tot > groups:
        Bm = jnp.pad(Bm, ((0, G_tot - groups), (0, 0)))
    Bm = Bm.reshape(n_gb, Rows, 1)
    Bm = jnp.pad(Bm, ((0, 0), (0, Rows_pad - Rows), (0, 0)))

    # --- grid: put the longer axis first so the v7x megacore can shard it ----
    if n_gb > n_s_tiles:
        grid = (n_gb, n_s_tiles)
        _g = lambda i, j: i
        _s = lambda i, j: j
    else:
        grid = (n_s_tiles, n_gb)
        _g = lambda i, j: j
        _s = lambda i, j: i

    flops = 2 * n_gb * Rows_pad * GBM_pad * NS_pad
    bytes_accessed = (n_gb * Rows_pad * GBM_pad * 2      # W (bf16)
                      + n_gb * Rows_pad * 4              # bias
                      + n_gb * GBM_pad * NS_pad * 2      # G (bf16)
                      + n_gb * Rows_pad * NS_pad * 4)    # out (f32)
    cost = pl.CostEstimate(flops=flops, transcendentals=0,
                           bytes_accessed=bytes_accessed)
    vmem_limit = int(min(usable, max(32 * 1024 * 1024, 2 * _vmem_need(TILE_S))))

    out = pl.pallas_call(
        _convt_epilogue_kernel,
        out_shape=jax.ShapeDtypeStruct((n_gb, Rows_pad, NS_pad), jnp.float32),
        grid_spec=pltpu.PrefetchScalarGridSpec(
            num_scalar_prefetch=0,
            grid=grid,
            in_specs=[
                # W/B block indices are invariant along the inner grid axis,
                # so their tiles are fetched once per group block.
                pl.BlockSpec((pl.Squeezed(), Rows_pad, GBM_pad),
                             lambda i, j: (_g(i, j), 0, 0)),
                pl.BlockSpec((pl.Squeezed(), Rows_pad, 1),
                             lambda i, j: (_g(i, j), 0, 0)),
                pl.BlockSpec((pl.Squeezed(), GBM_pad, TILE_S),
                             lambda i, j: (_g(i, j), 0, _s(i, j))),
            ],
            out_specs=pl.BlockSpec((pl.Squeezed(), Rows_pad, TILE_S),
                                   lambda i, j: (_g(i, j), 0, _s(i, j))),
        ),
        compiler_params=pltpu.CompilerParams(
            dimension_semantics=("parallel", "parallel"),
            vmem_limit_bytes=vmem_limit,
        ),
        cost_estimate=cost,
    )(Wbd, Bm, Gp)

    # TODO(synk): output kept f32 to match torch.clamp's dtype; a bf16 store
    #             would halve writeback traffic if the consumer allowed it.
    out = out[:, :Rows, :NS].reshape(G_tot, Cout_g, NS)[:groups]
    out = out.reshape(groups, Cout_g, N, Dout, Hout, Wout)
    out = jnp.transpose(out, (2, 0, 1, 3, 4, 5)).reshape(N, Cout, Dout, Hout, Wout)
    return out


def _reference(x, w, b, stride, padding, dilation, groups):
    """Independent loop reference. x/w are pre-rounded to bf16 (like the kernel's
    streamed operands); accumulation in f64 (kernel accumulates in f32)."""
    x = np.asarray(jnp.asarray(x).astype(jnp.bfloat16).astype(jnp.float32), np.float64)
    w = np.asarray(jnp.asarray(w).astype(jnp.bfloat16).astype(jnp.float32), np.float64)
    b = np.asarray(b, np.float64)
    N, Cin, Din, Hin, Win = x.shape
    Cout_g, kD, kH, kW = w.shape[1], w.shape[2], w.shape[3], w.shape[4]
    Cin_g = Cin // groups
    Cout = Cout_g * groups
    Dout = _out_len(Din, kD, stride, padding, dilation)
    Hout = _out_len(Hin, kH, stride, padding, dilation)
    Wout = _out_len(Win, kW, stride, padding, dilation)
    v1 = np.zeros((N, Cout, Dout, Hout, Wout)) + b.reshape(1, Cout, 1, 1, 1)
    for n in range(N):
        for g in range(groups):
            for cig in range(Cin_g):
                ci = g * Cin_g + cig
                for cog in range(Cout_g):
                    co = g * Cout_g + cog
                    for idd in range(Din):
                        for ih in range(Hin):
                            for iw in range(Win):
                                xv = x[n, ci, idd, ih, iw]
                                for kd in range(kD):
                                    od = idd * stride - padding + kd * dilation
                                    if not (0 <= od < Dout):
                                        continue
                                    for kh in range(kH):
                                        oh = ih * stride - padding + kh * dilation
                                        if not (0 <= oh < Hout):
                                            continue
                                        for kw_ in range(kW):
                                            ow = iw * stride - padding + kw_ * dilation
                                            if not (0 <= ow < Wout):
                                                continue
                                            v1[n, co, od, oh, ow] += xv * w[ci, cog, kd, kh, kw_]
    # Full original epilogue chain (== where(v1 < EPS, 1.0, v1)).
    v3_2 = (v1 < EPS).astype(np.float64)
    v3_6 = np.maximum(v1, v3_2)
    v3_2_4 = np.maximum(v1, v3_6)
    return np.maximum(v3_2_4, EPS), v1


if __name__ == "__main__":
    # Small, valid analog of ConvTranspose3d(503,100,55,stride=83,padding=1,dilation=41,groups=100)
    N, Cin, Din, Hin, Win = 2, 8, 4, 4, 3
    groups, Cout = 4, 4
    Cout_g = Cout // groups
    k, stride, padding, dilation = 3, 2, 1, 2

    key = jax.random.PRNGKey(0)
    kx, kwt, kb = jax.random.split(key, 3)
    x = jax.random.normal(kx, (N, Cin, Din, Hin, Win), jnp.float32)
    weight = jax.random.normal(kwt, (Cin, Cout_g, k, k, k), jnp.float32) * 0.1
    bias = jax.random.normal(kb, (Cout,), jnp.float32) * 0.1

    y = model_forward(x, weight, bias, stride=stride, padding=padding,
                      dilation=dilation, groups=groups)
    y = jax.block_until_ready(y)
    y_np = np.asarray(y, np.float64)

    ref, v1_ref = _reference(x, weight, bias, stride, padding, dilation, groups)

    # Accept either branch for elements whose pre-epilogue value sits within
    # accumulation-rounding distance of the 0.0061 threshold.
    close = np.isclose(y_np, ref, rtol=1e-3, atol=1e-3)
    near_thresh = np.abs(v1_ref - EPS) < 1e-4
    alt_ok = near_thresh & (np.isclose(y_np, 1.0, atol=1e-3)
                            | np.isclose(y_np, np.maximum(v1_ref, EPS), rtol=1e-3, atol=1e-3))
    if not bool(np.all(close | alt_ok)):
        bad = np.logical_not(close | alt_ok)
        raise AssertionError(f"mismatch at {int(bad.sum())} elements; "
                             f"max abs err {np.max(np.abs(y_np - ref)):.3e}")
    print("KERNEL_OK")
</pallas_src>

<mosaic_0001>
module attributes {stable_mosaic.version = 11 : i64} {
  func.func @_convt_epilogue_kernel(%arg0: i32, %arg1: i32, %arg2: memref<1x8x224xbf16, #tpu.memory_space<vmem>>, %arg3: memref<1x8x1xf32, #tpu.memory_space<vmem>>, %arg4: memref<1x224x1152xbf16, #tpu.memory_space<vmem>>, %arg5: memref<1x8x1152xf32, #tpu.memory_space<vmem>>) attributes {dimension_semantics = [#tpu.dimension_semantics<parallel>, #tpu.dimension_semantics<parallel>], iteration_bounds = array<i64: 1, 1>, scalar_prefetch = 0 : i64, scratch_operands = 0 : i64, tpu.core_type = #tpu.core_type<tc>, window_params = [{transform_indices = @transform_0, window_bounds = array<i64: 1, 8, 224>}, {transform_indices = @transform_1, window_bounds = array<i64: 1, 8, 1>}, {transform_indices = @transform_2, window_bounds = array<i64: 1, 224, 1152>}, {transform_indices = @transform_3, window_bounds = array<i64: 1, 8, 1152>}]} {
    %c0 = arith.constant 0 : index
    %c0_0 = arith.constant 0 : index
    %c0_1 = arith.constant 0 : index
    %0 = vector.load %arg2[%c0, %c0_0, %c0_1] : memref<1x8x224xbf16, #tpu.memory_space<vmem>>, vector<1x8x224xbf16>
    %1 = vector.shape_cast %0 : vector<1x8x224xbf16> to vector<8x224xbf16>
    %c0_2 = arith.constant 0 : index
    %c0_3 = arith.constant 0 : index
    %c0_4 = arith.constant 0 : index
    %2 = vector.load %arg4[%c0_2, %c0_3, %c0_4] : memref<1x224x1152xbf16, #tpu.memory_space<vmem>>, vector<1x224x1152xbf16>
    %3 = vector.shape_cast %2 : vector<1x224x1152xbf16> to vector<224x1152xbf16>
    %cst = arith.constant dense<0.000000e+00> : vector<8x1152xf32>
    %4 = tpu.matmul %1, %3, %cst {dimension_numbers = #tpu.dot_dimension_numbers<[1], [0], [0], [1], [0, 0, 1, 1], [], []>} : vector<8x224xbf16>, vector<224x1152xbf16>, vector<8x1152xf32> -> vector<8x1152xf32>
    %c0_5 = arith.constant 0 : index
    %c0_6 = arith.constant 0 : index
    %c0_7 = arith.constant 0 : index
    %5 = vector.load %arg3[%c0_5, %c0_6, %c0_7] : memref<1x8x1xf32, #tpu.memory_space<vmem>>, vector<1x8x1xf32>
    %6 = vector.shape_cast %5 : vector<1x8x1xf32> to vector<8x1xf32>
    %7 = vector.broadcast %6 : vector<8x1xf32> to vector<8x1152xf32>
    %8 = arith.addf %4, %7 : vector<8x1152xf32>
    %cst_8 = arith.constant 6.100000e-03 : f32
    %9 = vector.broadcast %cst_8 : f32 to vector<8x1152xf32>
    %10 = arith.cmpf olt, %8, %9 : vector<8x1152xf32>
    %cst_9 = arith.constant 1.000000e+00 : f32
    %11 = vector.broadcast %cst_9 : f32 to vector<8x1152xf32>
    %12 = arith.select %10, %11, %8 : vector<8x1152xi1>, vector<8x1152xf32>
    %c0_10 = arith.constant 0 : index
    %c0_11 = arith.constant 0 : index
    %c0_12 = arith.constant 0 : index
    %13 = vector.load %arg5[%c0_10, %c0_11, %c0_12] : memref<1x8x1152xf32, #tpu.memory_space<vmem>>, vector<1x8x1152xf32>
    %14 = vector.shape_cast %13 : vector<1x8x1152xf32> to vector<8x1152xf32>
    %15 = vector.shape_cast %12 : vector<8x1152xf32> to vector<1x8x1152xf32>
    tpu.vector_store %arg5[%c0_10, %c0_11, %c0_12], %15 {strides = array<i32>} : memref<1x8x1152xf32, #tpu.memory_space<vmem>>, vector<1x8x1152xf32>,
    return
  }
  func.func @transform_0(%arg0: i32, %arg1: i32) -> (i32, i32, i32) {
    %c0_i32 = arith.constant 0 : i32
    %c0_i32_0 = arith.constant 0 : i32
    %c0_i32_1 = arith.constant 0 : i32
    return %arg1, %c0_i32, %c0_i32_0 : i32, i32, i32
  }
  func.func @transform_1(%arg0: i32, %arg1: i32) -> (i32, i32, i32) {
    %c0_i32 = arith.constant 0 : i32
    %c0_i32_0 = arith.constant 0 : i32
    %c0_i32_1 = arith.constant 0 : i32
    return %arg1, %c0_i32, %c0_i32_0 : i32, i32, i32
  }
  func.func @transform_2(%arg0: i32, %arg1: i32) -> (i32, i32, i32) {
    %c0_i32 = arith.constant 0 : i32
    %c0_i32_0 = arith.constant 0 : i32
    return %arg1, %c0_i32, %arg0 : i32, i32, i32
  }
  func.func @transform_3(%arg0: i32, %arg1: i32) -> (i32, i32, i32) {
    %c0_i32 = arith.constant 0 : i32
    %c0_i32_0 = arith.constant 0 : i32
    return %arg1, %c0_i32, %arg0 : i32, i32, i32
  }
}

</mosaic_0001>

<bundles_post_ra>
// kernel: tpu_custom_call.1
= control target key start
LH: loop header
LB: loop body
LE: loop exit
PB: predicated region body
PF: predicated region fallthrough
CT: control target
= control target key end

     0   :  { %8 = vsyncpa [#allocation3], 0  ;;  %s1521_s0 = inlined_call_operand.vmem [shape: bf16[1,8,224], index: 0, kind: input, shape index: {}]   ;;  %s1522_s1 = inlined_call_operand.vmem [shape: f32[1,8,1], index: 1, kind: input, shape index: {}]   ;;  %s1523_s2 = inlined_call_operand.hbm [shape: bf16[1,224,1152], index: 2, kind: input, shape index: {}]   ;;  %s1524_s3 = inlined_call_operand.hbm [shape: f32[1,8,1152], index: 3, kind: output, shape index: {}]  }
   0x1   :  { %9 = vsyncpa [#allocation4], 0  ;;  %s1444_s12 = smov [#allocation2]  }
   0x2   :  { %s19_s13 = sshll.u32 %s1444_s12, 4  ;;  %s20_s13 = int_to_ptr.vmem [resolvable:$true] %s19_s13 }
   0x3   :  { %s1408_s14 = scalar_lea.vmem %s20_s13, 16128  ;;  %p1413_p1 = scmp.lt.s32.totalorder %s20_s13, %s20_s13 }
   0x4   :  { %p1409_p0 = scmp.ne.s32.totalorder %s20_s13, %s1408_s14  ;;  %p1414_p2 = scmp.lt.s32.totalorder %s1408_s14, %s1408_s14 }
   0x6   :  { %p1415_p3 = por %p1414_p2, %p1413_p1 }
   0x8   :  { %p1416_p4 = pnand %p1415_p3, %p1409_p0 }
   0xa   :  { %1419 = shalt.err (!%p1416_p4)
}
   0xb   :  { %s1445_s15 = smov 576   ;;  %s1446_s16 = smov 36  }
   0xc   :  { %25 = dma.hbm_to_vmem [thread:$0]  %s1523_s2, 16128, %s20_s13, [#allocation3], %s1445_s15, %s1445_s15, %s1446_s16  }
   0xd   :  { %1440 = dma.done.wait [#allocation3], 16128  }
   0xe   :  { %1441 = vsyncadd [#allocation3], 4294951168  ;;  %v1447_v0 = vmov 0   ;;  %v1216_v1 = vld [vmem:[#allocation2 + $0x1fc] ss:$36 sps:$4 sm:$0xff]   ;;  %vm827_vm0 = vcmask 785408  }
   0xf   :  { %1215 = vset.pattern.permute.xlu0 %v1447_v0  ;;  %v1218_v2 = vld [vmem:[#allocation2 + $0x1f8] ss:$36 sps:$4 sm:$0xff]   ;;  %831 = vmatprep.subr.bf16.mxu0 %v1216_v1  ;;  %v1221_v4 = vld [vmem:[#allocation2 + $0x1b0] ss:$36 sps:$4 sm:$0xff]   ;;  %v1224_v6 = vld [vmem:[#allocation2 + $0x168] ss:$36 sps:$4 sm:$0xff]  }
  0x10   :  { %v1219_v3 = vld [vmem:[#allocation2 + $0x1b4] ss:$36 sps:$4 sm:$0xff]   ;;  %832 = vmatpush1.bf16.msra.mxu0 %v1218_v2  ;;  %v1222_v5 = vld [vmem:[#allocation2 + $0x16c] ss:$36 sps:$4 sm:$0xff]   ;;  %v1225_v7 = vld [vmem:[#allocation2 + $0x124] ss:$36 sps:$4 sm:$0xff]  }
  0x11   :  { %833 = vmatprep.subr.bf16.mxu0 %v1219_v3  ;;  %v1227_v8 = vld [vmem:[#allocation2 + $0x120] ss:$36 sps:$4 sm:$0xff]   ;;  %v1230_v10 = vld [vmem:[#allocation2 + $0xd8] ss:$36 sps:$4 sm:$0xff]   ;;  %v1233_v14 = vld [vmem:[#allocation2 + $0x90] ss:$36 sps:$4 sm:$0xff]  }
  0x12   :  { %v1228_v9 = vld [vmem:[#allocation2 + $0xdc] ss:$36 sps:$4 sm:$0xff]   ;;  %v1231_v11 = vld [vmem:[#allocation2 + $0x94] ss:$36 sps:$4 sm:$0xff]   ;;  %v1254_v12 = vld [vmem:[#allocation2 + $0x204] ss:$36 sps:$4 sm:$0xff]  }
  0x13   :  { %v1257_v13 = vld [vmem:[#allocation2 + $0x200] ss:$36 sps:$4 sm:$0xff]   ;;  %872 = vmatprep.subr.bf16.mxu1 %v1254_v12  ;;  %v1234_v15 = vld [vmem:[#allocation2 + $0x4c] ss:$36 sps:$4 sm:$0xff]   ;;  %v1263_v17 = vld [vmem:[#allocation2 + $0x1b8] ss:$36 sps:$4 sm:$0xff]  }
  0x14   :  { %834 = vmatpush1.bf16.msra.mxu0 %v1221_v4  ;;  %873 = vmatpush1.bf16.msra.mxu1 %v1257_v13  ;;  %v1260_v16 = vld [vmem:[#allocation2 + $0x1bc] ss:$36 sps:$4 sm:$0xff]   ;;  %v1266_v20 = vld [vmem:[#allocation2 + $0x174] ss:$36 sps:$4 sm:$0xff]   ;;  %v1236_v21 = vld [vmem:[#allocation2 + $0x48] ss:$36 sps:$4 sm:$0xff]  }
  0x15   :  { %835 = vmatprep.subr.bf16.mxu0 %v1222_v5  ;;  %v1476_v18 = vld [vmem:[%s1521_s0] sm:$0xff]  ;;  %874 = vmatprep.subr.bf16.mxu1 %v1260_v16  ;;  %v1271_v23 = vld [vmem:[#allocation2 + $0x170] ss:$36 sps:$4 sm:$0xff]   ;;  %v1277_v27 = vld [vmem:[#allocation2 + $0x128] ss:$36 sps:$4 sm:$0xff]  }
  0x16   :  { %v1480_v19 = vcombine.high %v1476_v18, %v1476_v18  ;;  %v1237_v22 = vld [vmem:[#allocation2 + $0x4] ss:$36 sps:$4 sm:$0xff]   ;;  %v1272_v24 = vld [vmem:[#allocation2 + $0x12c] ss:$36 sps:$4 sm:$0xff]   ;;  %v1284_v32 = vld [vmem:[#allocation2 + $0x9c] ss:$36 sps:$4 sm:$0xff]   ;;  %v1488_v53 = vcombine.low %v1476_v18, %v1476_v18 }
  0x17   :  { %v1239_v25 = vld [vmem:[#allocation2] ss:$36 sps:$4 sm:$0xff]   ;;  %v1240_v26 = vld [vmem:[#allocation2 + $0x3ac] ss:$36 sps:$4 sm:$0xff]   ;;  %v1289_v35 = vld [vmem:[#allocation2 + $0x98] ss:$36 sps:$4 sm:$0xff]  }
  0x18   :  { %836 = vmatpush1.bf16.msra.mxu0 %v1224_v6  ;;  %875 = vmatpush1.bf16.msra.mxu1 %v1263_v17  ;;  %v1278_v28 = vld [vmem:[#allocation2 + $0xe4] ss:$36 sps:$4 sm:$0xff]   ;;  %v1246_v34 = vld [vmem:[#allocation2 + $0x31c] ss:$36 sps:$4 sm:$0xff]   ;;  %v1290_v36 = vld [vmem:[#allocation2 + $0x54] ss:$36 sps:$4 sm:$0xff]  }
  0x19   :  { %837 = vmatprep.subr.bf16.mxu0 %v1225_v7  ;;  %1205 = vmatprep.mubr.msk.bf16.mxu0 %vm827_vm0, %v1480_v19  ;;  %v1242_v29 = vld [vmem:[#allocation2 + $0x3a8] ss:$36 sps:$4 sm:$0xff]   ;;  %v1283_v31 = vld [vmem:[#allocation2 + $0xe0] ss:$36 sps:$4 sm:$0xff]   ;;  %v1248_v37 = vld [vmem:[#allocation2 + $0x318] ss:$36 sps:$4 sm:$0xff]  }
  0x1a   :  { %876 = vmatprep.subr.bf16.mxu1 %v1266_v20  ;;  %1206 = vmatprep.mubr.msk.bf16.mxu1 %vm827_vm0, %v1480_v19  ;;  %v1243_v30 = vld [vmem:[#allocation2 + $0x364] ss:$36 sps:$4 sm:$0xff]   ;;  %v1249_v38 = vld [vmem:[#allocation2 + $0x2d4] ss:$36 sps:$4 sm:$0xff]   ;;  %v1296_v40 = vld [vmem:[#allocation2 + $0xc] ss:$36 sps:$4 sm:$0xff]  }
  0x1b   :  { %v1245_v33 = vld [vmem:[#allocation2 + $0x360] ss:$36 sps:$4 sm:$0xff]   ;;  %v1295_v39 = vld [vmem:[#allocation2 + $0x50] ss:$36 sps:$4 sm:$0xff]   ;;  %v1301_v43 = vld [vmem:[#allocation2 + $0x8] ss:$36 sps:$4 sm:$0xff]  }
  0x1c   :  { %838 = vmatpush1.bf16.msra.mxu0 %v1227_v8  ;;  %877 = vmatpush1.bf16.msra.mxu1 %v1271_v23  ;;  %v1251_v41 = vld [vmem:[#allocation2 + $0x2d0] ss:$36 sps:$4 sm:$0xff]   ;;  %v1256_v45 = vld [vmem:[#allocation2 + $0x288] ss:$36 sps:$4 sm:$0xff]   ;;  %v1262_v49 = vld [vmem:[#allocation2 + $0x240] ss:$36 sps:$4 sm:$0xff]  }
  0x1d   :  { %839 = vmatprep.subr.bf16.mxu0 %v1228_v9  ;;  %878 = vmatprep.subr.bf16.mxu1 %v1272_v24  ;;  %v1252_v42 = vld [vmem:[#allocation2 + $0x28c] ss:$36 sps:$4 sm:$0xff]   ;;  %v1302_v44 = vld [vmem:[#allocation2 + $0x3b4] ss:$36 sps:$4 sm:$0xff]   ;;  %v1258_v46 = vld [vmem:[#allocation2 + $0x244] ss:$36 sps:$4 sm:$0xff]  }
  0x1e   :  { %v1307_v47 = vld [vmem:[#allocation2 + $0x3b0] ss:$36 sps:$4 sm:$0xff]   ;;  %v1313_v51 = vld [vmem:[#allocation2 + $0x368] ss:$36 sps:$4 sm:$0xff]   ;;  %v1319_v56 = vld [vmem:[#allocation2 + $0x320] ss:$36 sps:$4 sm:$0xff]  }
  0x1f   :  { %v1308_v48 = vld [vmem:[#allocation2 + $0x36c] ss:$36 sps:$4 sm:$0xff]   ;;  %v1314_v52 = vld [vmem:[#allocation2 + $0x324] ss:$36 sps:$4 sm:$0xff]   ;;  %v1320_v57 = vld [vmem:[#allocation2 + $0x2dc] ss:$36 sps:$4 sm:$0xff]  }
  0x20   :  { %840 = vmatpush1.bf16.msra.mxu0 %v1230_v10  ;;  %879 = vmatpush1.bf16.msra.mxu1 %v1277_v27  ;;  %v1270_v50 = vld [vmem:[#allocation2 + $0x20c] ss:$36 sps:$4 sm:$0xff]   ;;  %v1276_v55 = vld [vmem:[#allocation2 + $0x1c4] ss:$36 sps:$4 sm:$0xff]   ;;  %v1282_v59 = vld [vmem:[#allocation2 + $0x17c] ss:$36 sps:$4 sm:$0xff]  }
  0x21   :  { %841 = vmatprep.subr.bf16.mxu0 %v1231_v11  ;;  %880 = vmatprep.subr.bf16.mxu1 %v1278_v28  ;;  %v1268_v54 = vld [vmem:[#allocation2 + $0x208] ss:$36 sps:$4 sm:$0xff]   ;;  %v1274_v58 = vld [vmem:[#allocation2 + $0x1c0] ss:$36 sps:$4 sm:$0xff]   ;;  %v1325_v60 = vld [vmem:[#allocation2 + $0x2d8] ss:$36 sps:$4 sm:$0xff]  }
  0x22   :  { %v1326_v61 = vld [vmem:[#allocation2 + $0x294] ss:$36 sps:$4 sm:$0xff]   ;;  %v1332_v2 = vld [vmem:[#allocation2 + $0x24c] ss:$36 sps:$4 sm:$0xff]   ;;  %v171_v5 = vld [vmem:[%s1522_s1] sm:$0xff]  ;;  %s1448_s1 = smov [#allocation5]  }
  0x23   :  { %v1280_v62 = vld [vmem:[#allocation2 + $0x178] ss:$36 sps:$4 sm:$0xff]   ;;  %v1331_v1 = vld [vmem:[#allocation2 + $0x290] ss:$36 sps:$4 sm:$0xff]   ;;  %v1337_v6 = vld [vmem:[#allocation2 + $0x248] ss:$36 sps:$4 sm:$0xff]   ;;  %174 = vperm.xlu0 %1215, %v171_v5  }
  0x24   :  { %842 = vmatpush1.bf16.msra.mxu0 %v1233_v14  ;;  %881 = vmatpush1.bf16.msra.mxu1 %v1283_v31  ;;  %v1288_v63 = vld [vmem:[#allocation2 + $0x134] ss:$36 sps:$4 sm:$0xff]   ;;  %v1294_v4 = vld [vmem:[#allocation2 + $0xec] ss:$36 sps:$4 sm:$0xff]   ;;  %v1300_v9 = vld [vmem:[#allocation2 + $0xa4] ss:$36 sps:$4 sm:$0xff]  }
  0x25   :  { %843 = vmatprep.subr.bf16.mxu0 %v1234_v15  ;;  %882 = vmatprep.subr.bf16.mxu1 %v1284_v32  ;;  %v1286_v3 = vld [vmem:[#allocation2 + $0x130] ss:$36 sps:$4 sm:$0xff]   ;;  %v1292_v8 = vld [vmem:[#allocation2 + $0xe8] ss:$36 sps:$4 sm:$0xff]   ;;  %v1298_v12 = vld [vmem:[#allocation2 + $0xa0] ss:$36 sps:$4 sm:$0xff]  }
  0x26   :  { %v1343_v7 = vld [vmem:[#allocation2 + $0x214] ss:$36 sps:$4 sm:$0xff]   ;;  %v1349_v11 = vld [vmem:[#allocation2 + $0x1cc] ss:$36 sps:$4 sm:$0xff]   ;;  %v1306_v13 = vld [vmem:[#allocation2 + $0x5c] ss:$36 sps:$4 sm:$0xff]  }
  0x27   :  { %v1341_v10 = vld [vmem:[#allocation2 + $0x210] ss:$36 sps:$4 sm:$0xff]   ;;  %v1347_v14 = vld [vmem:[#allocation2 + $0x1c8] ss:$36 sps:$4 sm:$0xff]   ;;  %v1304_v16 = vld [vmem:[#allocation2 + $0x58] ss:$36 sps:$4 sm:$0xff]  }
  0x28   :  { %844 = vmatpush1.bf16.msra.mxu0 %v1236_v21  ;;  %883 = vmatpush1.bf16.msra.mxu1 %v1289_v35  ;;  %v1352_v15 = vld [vmem:[#allocation2 + $0x184] ss:$36 sps:$4 sm:$0xff]   ;;  %v1312_v17 = vld [vmem:[#allocation2 + $0x14] ss:$36 sps:$4 sm:$0xff]   ;;  %v1356_v20 = vld [vmem:[#allocation2 + $0x13c] ss:$36 sps:$4 sm:$0xff]  }
  0x29   :  { %845 = vmatprep.subr.bf16.mxu0 %v1237_v22  ;;  %884 = vmatprep.subr.bf16.mxu1 %v1290_v36  ;;  %v1350_v18 = vld [vmem:[#allocation2 + $0x180] ss:$36 sps:$4 sm:$0xff]   ;;  %v1310_v21 = vld [vmem:[#allocation2 + $0x10] ss:$36 sps:$4 sm:$0xff]   ;;  %v1354_v23 = vld [vmem:[#allocation2 + $0x138] ss:$36 sps:$4 sm:$0xff]  }
  0x2a   :  { %v1318_v22 = vld [vmem:[#allocation2 + $0x3bc] ss:$36 sps:$4 sm:$0xff]   ;;  %v1360_v24 = vld [vmem:[#allocation2 + $0xf4] ss:$36 sps:$4 sm:$0xff]   ;;  %v1364_v28 = vld [vmem:[#allocation2 + $0xac] ss:$36 sps:$4 sm:$0xff]  }
  0x2b   :  { %v1358_v27 = vld [vmem:[#allocation2 + $0xf0] ss:$36 sps:$4 sm:$0xff]   ;;  %v1362_v31 = vld [vmem:[#allocation2 + $0xa8] ss:$36 sps:$4 sm:$0xff]   ;;  %v1366_v35 = vld [vmem:[#allocation2 + $0x60] ss:$36 sps:$4 sm:$0xff]  }
  0x2c   :  { %846 = vmatpush1.bf16.msra.mxu0 %v1239_v25  ;;  %885 = vmatpush1.bf16.msra.mxu1 %v1295_v39  ;;  %v1316_v25 = vld [vmem:[#allocation2 + $0x3b8] ss:$36 sps:$4 sm:$0xff]   ;;  %v1368_v32 = vld [vmem:[#allocation2 + $0x64] ss:$36 sps:$4 sm:$0xff]   ;;  %s1068_s21 = sshll.u32 %s1448_s1, 4  ;;  %s1069_s21 = int_to_ptr.vmem [resolvable:$true] %s1068_s21 }
  0x2d   :  { %851 = vmatprep.subr.bf16.mxu0 %v1240_v26  ;;  %886 = vmatprep.subr.bf16.mxu1 %v1296_v40  ;;  %v1324_v26 = vld [vmem:[#allocation2 + $0x374] ss:$36 sps:$4 sm:$0xff]   ;;  %v1372_v36 = vld [vmem:[#allocation2 + $0x1c] ss:$36 sps:$4 sm:$0xff]   ;;  %v1376_v40 = vld [vmem:[#allocation2 + $0x3c4] ss:$36 sps:$4 sm:$0xff]   ;;  %p1425_p6 = scmp.lt.s32.totalorder %s1069_s21, %s1069_s21 }
  0x2e   :  { %v1370_v39 = vld [vmem:[#allocation2 + $0x18] ss:$36 sps:$4 sm:$0xff]   ;;  %v1399_v5 = vld [vmem:[#allocation2 + $0x260] ss:$36 sps:$4 sm:$0xff]   ;;  %s1420_s22 = scalar_lea.vmem %s1069_s21, 1152 }
  0x2f   :  { %p1421_p5 = scmp.ne.s32.totalorder %s1069_s21, %s1420_s22  ;;  %p1426_p7 = scmp.lt.s32.totalorder %s1420_s22, %s1420_s22 }
  0x30   :  { %852 = vmatpush2.bf16.msra.mxu0 %v1242_v29  ;;  %887 = vmatpush1.bf16.msra.mxu1 %v1301_v43  ;;  %v1322_v29 = vld [vmem:[#allocation2 + $0x370] ss:$36 sps:$4 sm:$0xff]   ;;  %v1374_v43 = vld [vmem:[#allocation2 + $0x3c0] ss:$36 sps:$4 sm:$0xff]  }
  0x31   :  { %853 = vmatprep.subr.bf16.mxu0 %v1243_v30  ;;  %892 = vmatprep.subr.bf16.mxu1 %v1302_v44  ;;  %v1330_v30 = vld [vmem:[#allocation2 + $0x32c] ss:$36 sps:$4 sm:$0xff]   ;;  %v1380_v44 = vld [vmem:[#allocation2 + $0x37c] ss:$36 sps:$4 sm:$0xff]   ;;  %p1427_p8 = por %p1426_p7, %p1425_p6 }
  0x33   :  { %p1428_p9 = pnand %p1427_p8, %p1421_p5 }
  0x34   :  { %854 = vmatpush2.bf16.msra.mxu0 %v1245_v33  ;;  %893 = vmatpush2.bf16.msra.mxu1 %v1307_v47  ;;  %v1328_v33 = vld [vmem:[#allocation2 + $0x328] ss:$36 sps:$4 sm:$0xff]   ;;  %v1384_v47 = vld [vmem:[#allocation2 + $0x334] ss:$36 sps:$4 sm:$0xff]  }
  0x35   :  { %855 = vmatprep.subr.bf16.mxu0 %v1246_v34  ;;  %894 = vmatprep.subr.bf16.mxu1 %v1308_v48  ;;  %v1336_v34 = vld [vmem:[#allocation2 + $0x2e4] ss:$36 sps:$4 sm:$0xff]   ;;  %v1353_v48 = vld [vmem:[#allocation2 + $0x218] ss:$36 sps:$4 sm:$0xff]  }
  0x38   :  { %856 = vmatpush2.bf16.msra.mxu0 %v1248_v37  ;;  %895 = vmatpush2.bf16.msra.mxu1 %v1313_v51  ;;  %v1334_v37 = vld [vmem:[#allocation2 + $0x2e0] ss:$36 sps:$4 sm:$0xff]   ;;  %v1357_v51 = vld [vmem:[#allocation2 + $0x1d0] ss:$36 sps:$4 sm:$0xff]  }
  0x39   :  { %857 = vmatprep.subr.bf16.mxu0 %v1249_v38  ;;  %896 = vmatprep.subr.bf16.mxu1 %v1314_v52  ;;  %v1340_v38 = vld [vmem:[#allocation2 + $0x29c] ss:$36 sps:$4 sm:$0xff]   ;;  %v1386_v52 = vld [vmem:[#allocation2 + $0x2e8] ss:$36 sps:$4 sm:$0xff]  }
  0x3c   :  { %858 = vmatpush2.bf16.msra.mxu0 %v1251_v41  ;;  %897 = vmatpush2.bf16.msra.mxu1 %v1319_v56  ;;  %v1338_v41 = vld [vmem:[#allocation2 + $0x298] ss:$36 sps:$4 sm:$0xff]   ;;  %v1390_v56 = vld [vmem:[#allocation2 + $0x2a0] ss:$36 sps:$4 sm:$0xff]  }
  0x3d   :  { %859 = vmatprep.subr.bf16.mxu0 %v1252_v42  ;;  %898 = vmatprep.subr.bf16.mxu1 %v1320_v57  ;;  %v1346_v42 = vld [vmem:[#allocation2 + $0x254] ss:$36 sps:$4 sm:$0xff]   ;;  %v1396_v57 = vld [vmem:[#allocation2 + $0x25c] ss:$36 sps:$4 sm:$0xff]  }
  0x40   :  { %860 = vmatpush2.bf16.msra.mxu0 %v1256_v45  ;;  %899 = vmatpush2.bf16.msra.mxu1 %v1325_v60  ;;  %v1344_v45 = vld [vmem:[#allocation2 + $0x250] ss:$36 sps:$4 sm:$0xff]  }
  0x41   :  { %861 = vmatprep.subr.bf16.mxu0 %v1258_v46  ;;  %900 = vmatprep.subr.bf16.mxu1 %v1326_v61  ;;  %v1378_v46 = vld [vmem:[#allocation2 + $0x378] ss:$36 sps:$4 sm:$0xff]   ;;  %v1373_v60 = vld [vmem:[#allocation2 + $0xb0] ss:$36 sps:$4 sm:$0xff]   ;;  %v1377_v61 = vld [vmem:[#allocation2 + $0x68] ss:$36 sps:$4 sm:$0xff]  }
  0x44   :  { %862 = vmatpush2.bf16.msra.mxu0 %v1262_v49  ;;  %901 = vmatpush2.bf16.msra.mxu1 %v1331_v1  ;;  %v1382_v49 = vld [vmem:[#allocation2 + $0x330] ss:$36 sps:$4 sm:$0xff]   ;;  %v1389_v1 = vld [vmem:[#allocation2 + $0x380] ss:$36 sps:$4 sm:$0xff]  }
  0x45   :  { %913 = vmatprep.subr.bf16.mxu0 %v1270_v50  ;;  %902 = vmatprep.subr.bf16.mxu1 %v1332_v2  ;;  %v1388_v50 = vld [vmem:[#allocation2 + $0x2ec] ss:$36 sps:$4 sm:$0xff]   ;;  %v1393_v2 = vld [vmem:[#allocation2 + $0x338] ss:$36 sps:$4 sm:$0xff]  }
  0x47   :  { %864 = vmatmul.mubr.bf16.vlgmr.msra.gmra.mxu0 %v1488_v53 }
  0x48   :  { %914 = vmatpush1.bf16.msra.mxu0 %v1268_v54  ;;  %1207 = vmatprep.mubr.msk.bf16.mxu0 %vm827_vm0, %v1480_v19  ;;  %v1392_v54 = vld [vmem:[#allocation2 + $0x2a4] ss:$36 sps:$4 sm:$0xff]  }
  0x49   :  { %915 = vmatprep.subr.bf16.mxu0 %v1276_v55  ;;  %903 = vmatpush2.bf16.msra.mxu1 %v1337_v6  ;;  %v1361_v55 = vld [vmem:[#allocation2 + $0x188] ss:$36 sps:$4 sm:$0xff]  }
  0x4a   :  { %954 = vmatprep.subr.bf16.mxu1 %v1343_v7 }
  0x4c   :  { %916 = vmatpush1.bf16.msra.mxu0 %v1274_v58  ;;  %905 = vmatmul.mubr.bf16.vlgmr.msra.gmra.mxu1 %v1488_v53  ;;  %v1365_v58 = vld [vmem:[#allocation2 + $0x140] ss:$36 sps:$4 sm:$0xff]  }
  0x4d   :  { %917 = vmatprep.subr.bf16.mxu0 %v1282_v59  ;;  %955 = vmatpush1.bf16.msra.mxu1 %v1341_v10  ;;  %v1369_v59 = vld [vmem:[#allocation2 + $0xf8] ss:$36 sps:$4 sm:$0xff]  }
  0x4e   :  { %956 = vmatprep.subr.bf16.mxu1 %v1349_v11  ;;  %1208 = vmatprep.mubr.msk.bf16.mxu1 %vm827_vm0, %v1480_v19 }
  0x50   :  { %918 = vmatpush1.bf16.msra.mxu0 %v1280_v62  ;;  %v1381_v62 = vld [vmem:[#allocation2 + $0x20] ss:$36 sps:$4 sm:$0xff]  }
  0x51   :  { %919 = vmatprep.subr.bf16.mxu0 %v1288_v63  ;;  %957 = vmatpush1.bf16.msra.mxu1 %v1347_v14  ;;  %v1385_v63 = vld [vmem:[#allocation2 + $0x3c8] ss:$36 sps:$4 sm:$0xff]  }
  0x52   :  { %958 = vmatprep.subr.bf16.mxu1 %v1352_v15 }
  0x54   :  { %920 = vmatpush1.bf16.msra.mxu0 %v1286_v3  ;;  %v1397_v3 = vld [vmem:[#allocation2 + $0x2f0] ss:$36 sps:$4 sm:$0xff]  }
  0x55   :  { %921 = vmatprep.subr.bf16.mxu0 %v1294_v4  ;;  %959 = vmatpush1.bf16.msra.mxu1 %v1350_v18  ;;  %v1398_v4 = vld [vmem:[#allocation2 + $0x2a8] ss:$36 sps:$4 sm:$0xff]  }
  0x56   :  { %960 = vmatprep.subr.bf16.mxu1 %v1356_v20 }
  0x58   :  { %922 = vmatpush1.bf16.msra.mxu0 %v1292_v8 }
  0x59   :  { %923 = vmatprep.subr.bf16.mxu0 %v1300_v9  ;;  %961 = vmatpush1.bf16.msra.mxu1 %v1354_v23 }
  0x5a   :  { %962 = vmatprep.subr.bf16.mxu1 %v1360_v24 }
  0x5c   :  { %924 = vmatpush1.bf16.msra.mxu0 %v1298_v12 }
  0x5d   :  { %925 = vmatprep.subr.bf16.mxu0 %v1306_v13  ;;  %963 = vmatpush1.bf16.msra.mxu1 %v1358_v27 }
  0x5e   :  { %964 = vmatprep.subr.bf16.mxu1 %v1364_v28 }
  0x60   :  { %926 = vmatpush1.bf16.msra.mxu0 %v1304_v16 }
  0x61   :  { %927 = vmatprep.subr.bf16.mxu0 %v1312_v17  ;;  %965 = vmatpush1.bf16.msra.mxu1 %v1362_v31 }
  0x62   :  { %966 = vmatprep.subr.bf16.mxu1 %v1368_v32 }
  0x64   :  { %928 = vmatpush1.bf16.msra.mxu0 %v1310_v21 }
  0x65   :  { %933 = vmatprep.subr.bf16.mxu0 %v1318_v22  ;;  %967 = vmatpush1.bf16.msra.mxu1 %v1366_v35 }
  0x66   :  { %968 = vmatprep.subr.bf16.mxu1 %v1372_v36 }
  0x68   :  { %934 = vmatpush2.bf16.msra.mxu0 %v1316_v25 }
  0x69   :  { %935 = vmatprep.subr.bf16.mxu0 %v1324_v26  ;;  %969 = vmatpush1.bf16.msra.mxu1 %v1370_v39 }
  0x6a   :  { %974 = vmatprep.subr.bf16.mxu1 %v1376_v40 }
  0x6c   :  { %936 = vmatpush2.bf16.msra.mxu0 %v1322_v29 }
  0x6d   :  { %937 = vmatprep.subr.bf16.mxu0 %v1330_v30  ;;  %975 = vmatpush2.bf16.msra.mxu1 %v1374_v43 }
  0x6e   :  { %976 = vmatprep.subr.bf16.mxu1 %v1380_v44 }
  0x70   :  { %938 = vmatpush2.bf16.msra.mxu0 %v1328_v33 }
  0x71   :  { %939 = vmatprep.subr.bf16.mxu0 %v1336_v34  ;;  %977 = vmatpush2.bf16.msra.mxu1 %v1378_v46 }
  0x72   :  { %978 = vmatprep.subr.bf16.mxu1 %v1384_v47 }
  0x74   :  { %940 = vmatpush2.bf16.msra.mxu0 %v1334_v37 }
  0x75   :  { %941 = vmatprep.subr.bf16.mxu0 %v1340_v38  ;;  %979 = vmatpush2.bf16.msra.mxu1 %v1382_v49 }
  0x76   :  { %980 = vmatprep.subr.bf16.mxu1 %v1388_v50 }
  0x78   :  { %942 = vmatpush2.bf16.msra.mxu0 %v1338_v41 }
  0x79   :  { %943 = vmatprep.subr.bf16.mxu0 %v1346_v42  ;;  %981 = vmatpush2.bf16.msra.mxu1 %v1386_v52 }
  0x7a   :  { %982 = vmatprep.subr.bf16.mxu1 %v1392_v54 }
  0x7c   :  { %944 = vmatpush2.bf16.msra.mxu0 %v1344_v45 }
  0x7d   :  { %995 = vmatprep.subr.bf16.mxu0 %v1447_v0  ;;  %983 = vmatpush2.bf16.msra.mxu1 %v1390_v56 }
  0x7e   :  { %984 = vmatprep.subr.bf16.mxu1 %v1396_v57 }
  0x7f   :  { %946 = vmatmul.mubr.bf16.vlgmr.msra.gmra.mxu0 %v1488_v53 }
  0x80   :  { %996 = vmatpush1.bf16.msra.mxu0 %v1353_v48  ;;  %1209 = vmatprep.mubr.msk.bf16.mxu0 %vm827_vm0, %v1480_v19  ;;  %v1394_v19 = vld [vmem:[#allocation2 + $0x258] ss:$36 sps:$4 sm:$0xff]  }
  0x81   :  { %997 = vmatprep.subr.bf16.mxu0 %v1447_v0  ;;  %985 = vmatpush2.bf16.msra.mxu1 %v1394_v19 }
  0x84   :  { %998 = vmatpush1.bf16.msra.mxu0 %v1357_v51  ;;  %987 = vmatmul.mubr.bf16.vlgmr.msra.gmra.mxu1 %v1488_v53 }
  0x85   :  { %999 = vmatprep.subr.bf16.mxu0 %v1447_v0 }
  0x88   :  { %1000 = vmatpush1.bf16.msra.mxu0 %v1361_v55 }
  0x89   :  { %1001 = vmatprep.subr.bf16.mxu0 %v1447_v0 }
  0x8c   :  { %1002 = vmatpush1.bf16.msra.mxu0 %v1365_v58 }
  0x8d   :  { %1003 = vmatprep.subr.bf16.mxu0 %v1447_v0 }
  0x90   :  { %1004 = vmatpush1.bf16.msra.mxu0 %v1369_v59 }
  0x91   :  { %1005 = vmatprep.subr.bf16.mxu0 %v1447_v0 }
  0x94   :  { %1006 = vmatpush1.bf16.msra.mxu0 %v1373_v60 }
  0x95   :  { %1007 = vmatprep.subr.bf16.mxu0 %v1447_v0 }
  0x98   :  { %1008 = vmatpush1.bf16.msra.mxu0 %v1377_v61 }
  0x99   :  { %1009 = vmatprep.subr.bf16.mxu0 %v1447_v0 }
  0x9c   :  { %1010 = vmatpush1.bf16.msra.mxu0 %v1381_v62 }
  0x9d   :  { %1015 = vmatprep.subr.bf16.mxu0 %v1447_v0 }
  0x9e   :  { %v175_v6 = vpop.permute.xlu0 %174 }
  0xa0   :  { %1016 = vmatpush2.bf16.msra.mxu0 %v1385_v63 }
  0xa1   :  { %1017 = vmatprep.subr.bf16.mxu0 %v1447_v0 }
  0xa4   :  { %1018 = vmatpush2.bf16.msra.mxu0 %v1389_v1 }
  0xa5   :  { %1019 = vmatprep.subr.bf16.mxu0 %v1447_v0 }
  0xa8   :  { %1020 = vmatpush2.bf16.msra.mxu0 %v1393_v2 }
  0xa9   :  { %1021 = vmatprep.subr.bf16.mxu0 %v1447_v0 }
  0xac   :  { %1022 = vmatpush2.bf16.msra.mxu0 %v1397_v3 }
  0xad   :  { %1023 = vmatprep.subr.bf16.mxu0 %v1447_v0 }
  0xb0   :  { %1024 = vmatpush2.bf16.msra.mxu0 %v1398_v4 }
  0xb1   :  { %1025 = vmatprep.subr.bf16.mxu0 %v1447_v0 }
  0xb4   :  { %1026 = vmatpush2.bf16.msra.mxu0 %v1399_v5 }
  0xb7   :  { %1028 = vmatmul.mubr.bf16.vlgmr.msra.gmra.mxu0 %v1488_v53 }
 0x107   :  { %v865_v7 = vpop.f32.mrf.mxu0 }
 0x108   :  { %v866_v8 = vadd.f32 %v865_v7, %v175_v6 }
 0x109   :  { %v867_v9 = vpop.f32.mrf.mxu0 }
 0x10a   :  { %vm1035_vm1 = vcmp.lt.f32.partialorder %v866_v8, 0.0061  ;;  %v868_v10 = vadd.f32 %v867_v9, %v175_v6 }
 0x10b   :  { %v1044_v11 = vsel %vm1035_vm1, 1.0, %v866_v8  ;;  %v869_v12 = vpop.f32.mrf.mxu0 }
 0x10c   :  { %1053 = vst [vmem:[#allocation5] sm:$0xff] %v1044_v11  ;;  %vm1036_vm2 = vcmp.lt.f32.partialorder %v868_v10, 0.0061  ;;  %v906_v15 = vpop.f32.mrf.mxu1 }
 0x10d   :  { %v1045_v13 = vsel %vm1036_vm2, 1.0, %v868_v10  ;;  %v870_v14 = vpop.f32.mrf.mxu0  ;;  %v907_v16 = vadd.f32 %v906_v15, %v175_v6 }
 0x10e   :  { %1054 = vst [vmem:[#allocation5 + $0x8] sm:$0xff] %v1045_v13  ;;  %v908_v17 = vpop.f32.mrf.mxu1 }
 0x10f   :  { %vm1037_vm3 = vcmp.lt.f32.partialorder %v907_v16, 0.0061  ;;  %v909_v0 = vadd.f32 %v908_v17, %v175_v6 }
 0x110   :  { %v1046_v18 = vsel %vm1037_vm3, 1.0, %v907_v16  ;;  %v910_v53 = vpop.f32.mrf.mxu1 }
 0x111   :  { %1055 = vst [vmem:[#allocation5 + $0x10] sm:$0xff] %v1046_v18  ;;  %vm1038_vm4 = vcmp.lt.f32.partialorder %v909_v0, 0.0061 }
 0x112   :  { %v1047_v20 = vsel %vm1038_vm4, 1.0, %v909_v0  ;;  %v911_v21 = vpop.f32.mrf.mxu1 }
 0x113   :  { %1056 = vst [vmem:[#allocation5 + $0x18] sm:$0xff] %v1047_v20 }
 0x13f   :  { %v947_v22 = vpop.f32.mrf.mxu0 }
 0x140   :  { %v948_v23 = vadd.f32 %v947_v22, %v175_v6 }
 0x141   :  { %v949_v24 = vpop.f32.mrf.mxu0 }
 0x142   :  { %vm1039_vm5 = vcmp.lt.f32.partialorder %v948_v23, 0.0061  ;;  %v950_v25 = vadd.f32 %v949_v24, %v175_v6 }
 0x143   :  { %v1048_v26 = vsel %vm1039_vm5, 1.0, %v948_v23  ;;  %v951_v27 = vpop.f32.mrf.mxu0 }
 0x144   :  { %1057 = vst [vmem:[#allocation5 + $0x20] sm:$0xff] %v1048_v26  ;;  %vm1040_vm6 = vcmp.lt.f32.partialorder %v950_v25, 0.0061  ;;  %v988_v30 = vpop.f32.mrf.mxu1 }
 0x145   :  { %v1049_v28 = vsel %vm1040_vm6, 1.0, %v950_v25  ;;  %v952_v29 = vpop.f32.mrf.mxu0  ;;  %v989_v31 = vadd.f32 %v988_v30, %v175_v6 }
 0x146   :  { %1058 = vst [vmem:[#allocation5 + $0x28] sm:$0xff] %v1049_v28  ;;  %v990_v32 = vpop.f32.mrf.mxu1 }
 0x147   :  { %vm1041_vm7 = vcmp.lt.f32.partialorder %v989_v31, 0.0061  ;;  %v991_v33 = vadd.f32 %v990_v32, %v175_v6 }
 0x148   :  { %v1050_v34 = vsel %vm1041_vm7, 1.0, %v989_v31  ;;  %v992_v35 = vpop.f32.mrf.mxu1 }
 0x149   :  { %1059 = vst [vmem:[#allocation5 + $0x30] sm:$0xff] %v1050_v34  ;;  %vm1042_vm8 = vcmp.lt.f32.partialorder %v991_v33, 0.0061 }
 0x14a   :  { %v1051_v36 = vsel %vm1042_vm8, 1.0, %v991_v33  ;;  %v993_v37 = vpop.f32.mrf.mxu1 }
 0x14b   :  { %1060 = vst [vmem:[#allocation5 + $0x38] sm:$0xff] %v1051_v36 }
 0x177   :  { %v1029_v38 = vpop.f32.mrf.mxu0 }
 0x178   :  { %v1030_v39 = vadd.f32 %v1029_v38, %v175_v6 }
 0x179   :  { %v1031_v40 = vpop.f32.mrf.mxu0 }
 0x17a   :  { %vm1043_vm9 = vcmp.lt.f32.partialorder %v1030_v39, 0.0061 }
 0x17b   :  { %v1052_v41 = vsel %vm1043_vm9, 1.0, %v1030_v39  ;;  %v1032_v42 = vpop.f32.mrf.mxu0 }
 0x17c   :  { %1061 = vst [vmem:[#allocation5 + $0x40] sm:$0xff] %v1052_v41 }
 0x17d   :  { %v1033_v43 = vpop.f32.mrf.mxu0 }
 0x17e   :  { %1431 = shalt.err (!%p1428_p9)
}
 0x17f   :  { %1071 = dma.vmem_to_hbm [thread:$0]  %s1069_s21, 1152, %s1524_s3, [#allocation4]  }
 0x180   :  { %1442 = dma.done.wait [#allocation4], 1152  }
 0x181   :  { %1443 = vsyncadd [#allocation4], 4294966144 }
 0x182   :  { %1075 = vsyncpa [#allocation3], 1 }
 0x183   :  { %1076 = vsyncpa [#allocation4], 1 }

</bundles_post_ra>
